<compile_context>
chip_gen: v5e
topology: v5e:2x2
jax: 0.10.0
libtpu: 0.0.40
codegen_flags: <defaults>
</compile_context>

<pallas_src>
import jax
import jax.numpy as jnp
from jax.experimental import pallas as pl
from jax.experimental.pallas import tpu as pltpu  # noqa: F401  (TPU backend)


def _unsqueeze_copy_kernel(z_ref, o_ref):
    # z_ref: (B, D) input block.
    # o_ref: (B, D) view of the (B, 1, D) output (the size-1 dim is squeezed
    #        by the output BlockSpec), so this is a plain full-block copy.
    o_ref[...] = z_ref[...]


def dummy_mapping(z, c=None, **kwargs):
    """DummyMapping.forward: returns z.unsqueeze(1), i.e. (B, D) -> (B, 1, D)."""
    del c, kwargs  # unused, matches the PyTorch forward signature
    b, d = z.shape

    # No grid: the kernel runs once on whole-array VMEM blocks (no pipeline
    # prologue/epilogue, no scf.for, no per-step overhead).
    return pl.pallas_call(
        _unsqueeze_copy_kernel,
        out_shape=jax.ShapeDtypeStruct((b, 1, d), z.dtype),
        in_specs=[pl.BlockSpec((b, d), lambda: (0, 0))],
        out_specs=pl.BlockSpec((b, None, d), lambda: (0, 0, 0)),
    )(z)


if __name__ == "__main__":
    B, Z_DIM = 2, 256  # FastGAN default z_dim; multiple of 128 -> lane-dense store
    key = jax.random.PRNGKey(0)
    z = jax.random.normal(key, (B, Z_DIM), jnp.float32)

    # The unused conditioning `c` is dropped before jit (review item: do not
    # trace/transfer a degenerate (B, 0) array every call).
    out = jax.jit(dummy_mapping)(z)
    out = jax.block_until_ready(out)

    assert out.shape == (B, 1, Z_DIM), out.shape
    assert out.dtype == jnp.float32
    # Semantics check against the reference: z.unsqueeze(1)
    ref = jnp.expand_dims(z, 1)
    assert jnp.array_equal(out, ref)
    print("KERNEL_OK")
</pallas_src>

<mosaic_0001>
module attributes {stable_mosaic.version = 11 : i64} {
  func.func @_unsqueeze_copy_kernel(%arg0: memref<2x256xf32, #tpu.memory_space<vmem>>, %arg1: memref<2x1x256xf32, #tpu.memory_space<vmem>>) attributes {dimension_semantics = [], scalar_prefetch = 0 : i64, scratch_operands = 0 : i64, tpu.core_type = #tpu.core_type<tc>} {
    %c0 = arith.constant 0 : index
    %c0_0 = arith.constant 0 : index
    %0 = vector.load %arg0[%c0, %c0_0] : memref<2x256xf32, #tpu.memory_space<vmem>>, vector<2x256xf32>
    %c0_1 = arith.constant 0 : index
    %c0_2 = arith.constant 0 : index
    %c0_3 = arith.constant 0 : index
    %1 = vector.load %arg1[%c0_1, %c0_2, %c0_3] : memref<2x1x256xf32, #tpu.memory_space<vmem>>, vector<2x1x256xf32>
    %2 = vector.shape_cast %1 : vector<2x1x256xf32> to vector<2x256xf32>
    %3 = vector.shape_cast %0 : vector<2x256xf32> to vector<2x1x256xf32>
    tpu.vector_store %arg1[%c0_1, %c0_2, %c0_3], %3 {strides = array<i32>} : memref<2x1x256xf32, #tpu.memory_space<vmem>>, vector<2x1x256xf32>,
    return
  }
}

</mosaic_0001>

<bundles_post_ra>
// kernel: dummy_mapping.1
= control target key start
LH: loop header
LB: loop body
LE: loop exit
PB: predicated region body
PF: predicated region fallthrough
CT: control target
= control target key end

     0   :  { %6 = vsyncpa [#allocation3], 0  ;;  %s144_s0 = inlined_call_operand.hbm [shape: f32[2,256], index: 0, kind: input, shape index: {}]   ;;  %s145_s1 = inlined_call_operand.hbm [shape: f32[2,1,256], index: 1, kind: output, shape index: {}]  }
   0x1   :  { %7 = vsyncpa [#allocation4], 0  ;;  %s13_s8 = sshll.u32 %s144_s0, 4  ;;  %s124_s9 = smov [#allocation2]   ;;  %s14_s8 = int_to_ptr.hbm [resolvable:$true] %s13_s8 }
   0x2   :  { %s15_s10 = sshll.u32 %s124_s9, 4  ;;  %s16_s10 = int_to_ptr.vmem [resolvable:$true] %s15_s10 }
   0x3   :  { %18 = dma.hbm_to_vmem [thread:$0]  %s14_s8, 64, %s16_s10, [#allocation3]  }
   0x4   :  { %120 = dma.done.wait [#allocation3], 64  }
   0x5   :  { %121 = vsyncadd [#allocation3], 4294967232  ;;  %v43_v0 = vlaneseq  ;;  %vm28_vm0 = vcmask 1040384   ;;  %v23_v1 = vld [vmem:[#allocation2] sm:$0xf]  ;;  %vm30_vm1 = vcmask 1042434  }
   0x6   :  { %vm32_vm2 = vcmask 1041408   ;;  %vm34_vm3 = vcmask 1041409   ;;  %vm36_vm4 = vcmask 1043459   ;;  %v25_v2 = vrot.slane %v23_v1, 1  ;;  %s125_s11 = smov [#allocation5]   ;;  %s55_s14 = sshll.u32 %s145_s1, 4  ;;  %s56_s14 = int_to_ptr.hbm [resolvable:$true] %s55_s14 }
   0x7   :  { %v26_v3 = vrot.slane %v23_v1, 2  ;;  %v27_v4 = vrot.slane %v23_v1, 3  ;;  %vm38_vm5 = vcmask 1042433   ;;  %s53_s0 = sshll.u32 %s125_s11, 4  ;;  %vm45_vm6 = vcmp.lt.s32.totalorder %v43_v0, 256  ;;  %s126_s15 = smov 32   ;;  %s54_s0 = int_to_ptr.vmem [resolvable:$true] %s53_s0 }
   0x8   :  { %v29_v5 = vsel %vm28_vm0, %v23_v1, %v25_v2  ;;  %v35_v7 = vsel %vm34_vm3, %v23_v1, %v25_v2  ;;  %s127_s16 = smov 2  }
   0x9   :  { %v31_v6 = vsel %vm30_vm1, %v26_v3, %v27_v4  ;;  %v37_v8 = vsel %vm36_vm4, %v26_v3, %v27_v4 }
   0xa   :  { %v33_v9 = vsel %vm32_vm2, %v29_v5, %v31_v6  ;;  %v39_v10 = vsel %vm38_vm5, %v35_v7, %v37_v8 }
   0xb   :  { %47 = vst.msk [vmem:[#allocation5] sm:$0x3] %vm45_vm6, %v33_v9  ;;  %v40_v11 = vrot.slane %v39_v10, 1 }
   0xd   :  { %48 = vst.msk [vmem:[#allocation5 + $0x2] sm:$0x3] %vm45_vm6, %v40_v11 }
   0xe   :  { %61 = dma.vmem_to_hbm [thread:$0]  %s54_s0, 64, %s56_s14, [#allocation4], %s126_s15, %s126_s15, %s127_s16  }
   0xf   :  { %122 = dma.done.wait [#allocation4], 64  }
  0x10   :  { %123 = vsyncadd [#allocation4], 4294967232 }
  0x11   :  { %66 = vsyncpa [#allocation3], 1 }
  0x12   :  { %67 = vsyncpa [#allocation4], 1 }

</bundles_post_ra>
